<compile_context>
chip_gen: v7x
topology: tpu7x:2x2x1
jax: 0.10.0
libtpu: 0.0.40
codegen_flags: <defaults>
</compile_context>

<pallas_src>
import jax
import jax.numpy as jnp
from jax.experimental import pallas as pl
from jax.experimental.pallas import tpu as pltpu

_FEAT = 256          # c*h*w per input
_TILE_M_MAX = 2048   # batch-tile rows (working set ~11 MiB double-buffered)


def _round_up(x, m):
    return ((x + m - 1) // m) * m


def _vmax_gf_kernel(x1_ref, x2_ref, w1a_ref, w1b_ref, b1_ref, w2_ref, b2_ref,
                    o_ref):
    # x1_ref, x2_ref: (TM, 256) f32 activation tiles (cast to bf16 here)
    # w1a_ref, w1b_ref: (256, 256) bf16  -- W1^T split along its input dim
    # b1_ref, b2_ref:  (1, 256) f32
    # w2_ref:          (256, 256) bf16  -- W2^T
    # o_ref:           (TM, 256) out_dtype (bf16 by default)
    x1 = x1_ref[...].astype(jnp.bfloat16)
    x2 = x2_ref[...].astype(jnp.bfloat16)
    pre = (
        jnp.dot(x1, w1a_ref[...], preferred_element_type=jnp.float32)
        + jnp.dot(x2, w1b_ref[...], preferred_element_type=jnp.float32)
        + b1_ref[...]
    )
    h = jnp.tanh(pre)
    y = (
        jnp.dot(h.astype(jnp.bfloat16), w2_ref[...],
                preferred_element_type=jnp.float32)
        + b2_ref[...]
    )
    o_ref[...] = y.astype(o_ref.dtype)


def make_vmax_gf(w1, b1, w2, b2, *, tile_m=_TILE_M_MAX,
                 out_dtype=jnp.bfloat16):
    """Build a forward fn with weights prepared once.

    w1: (256, 512), w2: (256, 256) in PyTorch (out, in) convention;
    b1, b2: (256,).
    """
    w1_t = jnp.transpose(w1).astype(jnp.bfloat16)        # (512, 256)
    w1a = w1_t[:_FEAT]                                   # (256, 256) for x1
    w1b = w1_t[_FEAT:]                                   # (256, 256) for x2
    w2_t = jnp.transpose(w2).astype(jnp.bfloat16)        # (256, 256)
    b1_2d = b1.reshape(1, _FEAT).astype(jnp.float32)
    b2_2d = b2.reshape(1, _FEAT).astype(jnp.float32)

    @jax.jit
    def forward(x1, x2):
        bs, c, h, w = x1.shape
        assert c * h * w == _FEAT, "Vmax_GF requires c*h*w == 256"

        # Row-major flatten over (C, H, W) == PyTorch nn.Flatten.
        # Trailing-dim collapse -> no data movement; dtype left as-is (cast to
        # bf16 happens inside the kernel, saving an HBM pass).
        x1f = x1.reshape(bs, _FEAT)
        x2f = x2.reshape(bs, _FEAT)

        # Batch tile: sublane-aligned (multiple of 8); keep >= 2 grid steps
        # whenever bs allows so both v7x TensorCores get work.  Pallas masks
        # the partial last block, so no padding / output slicing is needed.
        tm = min(tile_m, max(8, _round_up(pl.cdiv(bs, 2), 8)))
        grid = (pl.cdiv(bs, tm),)

        act_spec = pl.BlockSpec((tm, _FEAT), lambda i: (i, 0))
        out_spec = pl.BlockSpec((tm, _FEAT), lambda i: (i, 0))
        wt_spec = pl.BlockSpec((_FEAT, _FEAT), lambda i: (0, 0))
        bias_spec = pl.BlockSpec((1, _FEAT), lambda i: (0, 0))

        flops = 2 * bs * (_FEAT * _FEAT * 3)        # two K=256 dots + one K=256
        bytes_accessed = (
            2 * bs * _FEAT * 4                      # x1f, x2f (f32)
            + 3 * _FEAT * _FEAT * 2                 # w1a, w1b, w2 (bf16)
            + 2 * _FEAT * 4                         # biases (f32)
            + bs * _FEAT * jnp.dtype(out_dtype).itemsize   # output
        )

        out = pl.pallas_call(
            _vmax_gf_kernel,
            out_shape=jax.ShapeDtypeStruct((bs, _FEAT), out_dtype),
            grid=grid,
            in_specs=[act_spec, act_spec, wt_spec, wt_spec, bias_spec,
                      wt_spec, bias_spec],
            out_specs=out_spec,
            compiler_params=pltpu.CompilerParams(
                dimension_semantics=("parallel",),
                vmem_limit_bytes=32 * 1024 * 1024),
            cost_estimate=pl.CostEstimate(
                flops=flops,
                transcendentals=bs * _FEAT,
                bytes_accessed=bytes_accessed),
        )(x1f, x2f, w1a, w1b, b1_2d, w2_t, b2_2d)

        return out.reshape(bs, c, h, w)

    return forward


def _reference_forward(x1, x2, w1, b1, w2, b2):
    bs, c, h, w = x1.shape
    x = jnp.concatenate([x1.reshape(bs, -1), x2.reshape(bs, -1)], axis=1)
    fusion = jnp.tanh(x @ w1.T + b1)
    fusion = fusion @ w2.T + b2
    return fusion.reshape(bs, c, h, w)


if __name__ == "__main__":
    key = jax.random.PRNGKey(0)
    k_x1, k_x2, k_w1, k_b1, k_w2, k_b2, k_y1, k_y2 = jax.random.split(key, 8)

    # c*h*w must equal 256 -> (c, h, w) = (4, 8, 8)
    c, h, w = 4, 8, 8

    # Deterministic parameters (PyTorch Linear convention: weight (out, in)).
    w1 = jax.random.normal(k_w1, (256, 512), dtype=jnp.float32) * 0.02
    b1 = jax.random.normal(k_b1, (256,), dtype=jnp.float32) * 0.02
    w2 = jax.random.normal(k_w2, (256, 256), dtype=jnp.float32) * 0.02
    b2 = jax.random.normal(k_b2, (256,), dtype=jnp.float32) * 0.02

    fwd = make_vmax_gf(w1, b1, w2, b2)

    # Tiny batch (single partial block: tm=8, grid=(1,)).
    bs = 2
    x1 = jax.random.normal(k_x1, (bs, c, h, w), dtype=jnp.float32)
    x2 = jax.random.normal(k_x2, (bs, c, h, w), dtype=jnp.float32)
    out = jax.block_until_ready(fwd(x1, x2))
    ref = _reference_forward(x1, x2, w1, b1, w2, b2)
    assert out.shape == (bs, c, h, w)
    # bf16 weights/output with f32 accumulation -> relaxed tolerance.
    assert jnp.allclose(out.astype(jnp.float32), ref, atol=2e-2, rtol=2e-2), \
        "mismatch vs reference (bs=2)"

    # Odd batch (tm=24, grid=(2,), partial last block of 13 valid rows).
    bs2 = 37
    y1 = jax.random.normal(k_y1, (bs2, c, h, w), dtype=jnp.float32)
    y2 = jax.random.normal(k_y2, (bs2, c, h, w), dtype=jnp.float32)
    out2 = jax.block_until_ready(fwd(y1, y2))
    ref2 = _reference_forward(y1, y2, w1, b1, w2, b2)
    assert out2.shape == (bs2, c, h, w)
    assert jnp.allclose(out2.astype(jnp.float32), ref2, atol=2e-2, rtol=2e-2), \
        "mismatch vs reference (bs=37)"

    print("KERNEL_OK")
</pallas_src>

<mosaic_0001>
module attributes {stable_mosaic.version = 11 : i64} {
  func.func @_vmax_gf_kernel(%arg0: i32, %arg1: memref<8x256xf32, #tpu.memory_space<vmem>>, %arg2: memref<8x256xf32, #tpu.memory_space<vmem>>, %arg3: memref<256x256xbf16, #tpu.memory_space<vmem>>, %arg4: memref<256x256xbf16, #tpu.memory_space<vmem>>, %arg5: memref<1x256xf32, #tpu.memory_space<vmem>>, %arg6: memref<256x256xbf16, #tpu.memory_space<vmem>>, %arg7: memref<1x256xf32, #tpu.memory_space<vmem>>, %arg8: memref<8x256xbf16, #tpu.memory_space<vmem>>) attributes {dimension_semantics = [#tpu.dimension_semantics<parallel>], iteration_bounds = array<i64: 1>, scalar_prefetch = 0 : i64, scratch_operands = 0 : i64, tpu.core_type = #tpu.core_type<tc>, window_params = [{transform_indices = @transform_0, window_bounds = array<i64: 8, 256>}, {transform_indices = @transform_1, window_bounds = array<i64: 8, 256>}, {pipeline_mode = #tpu.pipeline_mode<synchronous>, transform_indices = @transform_2, window_bounds = array<i64: 256, 256>}, {pipeline_mode = #tpu.pipeline_mode<synchronous>, transform_indices = @transform_3, window_bounds = array<i64: 256, 256>}, {pipeline_mode = #tpu.pipeline_mode<synchronous>, transform_indices = @transform_4, window_bounds = array<i64: 1, 256>}, {pipeline_mode = #tpu.pipeline_mode<synchronous>, transform_indices = @transform_5, window_bounds = array<i64: 256, 256>}, {pipeline_mode = #tpu.pipeline_mode<synchronous>, transform_indices = @transform_6, window_bounds = array<i64: 1, 256>}, {transform_indices = @transform_7, window_bounds = array<i64: 8, 256>}]} {
    %c0 = arith.constant 0 : index
    %c0_0 = arith.constant 0 : index
    %0 = vector.load %arg1[%c0, %c0_0] : memref<8x256xf32, #tpu.memory_space<vmem>>, vector<8x256xf32>
    %1 = arith.truncf %0 : vector<8x256xf32> to vector<8x256xbf16>
    %c0_1 = arith.constant 0 : index
    %c0_2 = arith.constant 0 : index
    %2 = vector.load %arg2[%c0_1, %c0_2] : memref<8x256xf32, #tpu.memory_space<vmem>>, vector<8x256xf32>
    %3 = arith.truncf %2 : vector<8x256xf32> to vector<8x256xbf16>
    %c0_3 = arith.constant 0 : index
    %c0_4 = arith.constant 0 : index
    %4 = vector.load %arg3[%c0_3, %c0_4] : memref<256x256xbf16, #tpu.memory_space<vmem>>, vector<256x256xbf16>
    %cst = arith.constant dense<0.000000e+00> : vector<8x256xf32>
    %5 = tpu.matmul %1, %4, %cst {dimension_numbers = #tpu.dot_dimension_numbers<[1], [0], [0], [1], [0, 0, 1, 1], [], []>} : vector<8x256xbf16>, vector<256x256xbf16>, vector<8x256xf32> -> vector<8x256xf32>
    %c0_5 = arith.constant 0 : index
    %c0_6 = arith.constant 0 : index
    %6 = vector.load %arg4[%c0_5, %c0_6] : memref<256x256xbf16, #tpu.memory_space<vmem>>, vector<256x256xbf16>
    %cst_7 = arith.constant dense<0.000000e+00> : vector<8x256xf32>
    %7 = tpu.matmul %3, %6, %cst_7 {dimension_numbers = #tpu.dot_dimension_numbers<[1], [0], [0], [1], [0, 0, 1, 1], [], []>} : vector<8x256xbf16>, vector<256x256xbf16>, vector<8x256xf32> -> vector<8x256xf32>
    %8 = arith.addf %5, %7 : vector<8x256xf32>
    %c0_8 = arith.constant 0 : index
    %c0_9 = arith.constant 0 : index
    %9 = vector.load %arg5[%c0_8, %c0_9] : memref<1x256xf32, #tpu.memory_space<vmem>>, vector<1x256xf32>
    %10 = vector.broadcast %9 : vector<1x256xf32> to vector<8x256xf32>
    %11 = arith.addf %8, %10 : vector<8x256xf32>
    %12 = math.tanh %11 : vector<8x256xf32>
    %13 = arith.truncf %12 : vector<8x256xf32> to vector<8x256xbf16>
    %c0_10 = arith.constant 0 : index
    %c0_11 = arith.constant 0 : index
    %14 = vector.load %arg6[%c0_10, %c0_11] : memref<256x256xbf16, #tpu.memory_space<vmem>>, vector<256x256xbf16>
    %cst_12 = arith.constant dense<0.000000e+00> : vector<8x256xf32>
    %15 = tpu.matmul %13, %14, %cst_12 {dimension_numbers = #tpu.dot_dimension_numbers<[1], [0], [0], [1], [0, 0, 1, 1], [], []>} : vector<8x256xbf16>, vector<256x256xbf16>, vector<8x256xf32> -> vector<8x256xf32>
    %c0_13 = arith.constant 0 : index
    %c0_14 = arith.constant 0 : index
    %16 = vector.load %arg7[%c0_13, %c0_14] : memref<1x256xf32, #tpu.memory_space<vmem>>, vector<1x256xf32>
    %17 = vector.broadcast %16 : vector<1x256xf32> to vector<8x256xf32>
    %18 = arith.addf %15, %17 : vector<8x256xf32>
    %19 = arith.truncf %18 : vector<8x256xf32> to vector<8x256xbf16>
    %c0_15 = arith.constant 0 : index
    %c0_16 = arith.constant 0 : index
    %20 = vector.load %arg8[%c0_15, %c0_16] : memref<8x256xbf16, #tpu.memory_space<vmem>>, vector<8x256xbf16>
    tpu.vector_store %arg8[%c0_15, %c0_16], %19 {strides = array<i32>} : memref<8x256xbf16, #tpu.memory_space<vmem>>, vector<8x256xbf16>,
    return
  }
  func.func @transform_0(%arg0: i32) -> (i32, i32) {
    %c0_i32 = arith.constant 0 : i32
    %c0_i32_0 = arith.constant 0 : i32
    return %arg0, %c0_i32 : i32, i32
  }
  func.func @transform_1(%arg0: i32) -> (i32, i32) {
    %c0_i32 = arith.constant 0 : i32
    %c0_i32_0 = arith.constant 0 : i32
    return %arg0, %c0_i32 : i32, i32
  }
  func.func @transform_2(%arg0: i32) -> (i32, i32) {
    %c0_i32 = arith.constant 0 : i32
    %c0_i32_0 = arith.constant 0 : i32
    %c0_i32_1 = arith.constant 0 : i32
    return %c0_i32, %c0_i32_0 : i32, i32
  }
  func.func @transform_3(%arg0: i32) -> (i32, i32) {
    %c0_i32 = arith.constant 0 : i32
    %c0_i32_0 = arith.constant 0 : i32
    %c0_i32_1 = arith.constant 0 : i32
    return %c0_i32, %c0_i32_0 : i32, i32
  }
  func.func @transform_4(%arg0: i32) -> (i32, i32) {
    %c0_i32 = arith.constant 0 : i32
    %c0_i32_0 = arith.constant 0 : i32
    %c0_i32_1 = arith.constant 0 : i32
    return %c0_i32, %c0_i32_0 : i32, i32
  }
  func.func @transform_5(%arg0: i32) -> (i32, i32) {
    %c0_i32 = arith.constant 0 : i32
    %c0_i32_0 = arith.constant 0 : i32
    %c0_i32_1 = arith.constant 0 : i32
    return %c0_i32, %c0_i32_0 : i32, i32
  }
  func.func @transform_6(%arg0: i32) -> (i32, i32) {
    %c0_i32 = arith.constant 0 : i32
    %c0_i32_0 = arith.constant 0 : i32
    %c0_i32_1 = arith.constant 0 : i32
    return %c0_i32, %c0_i32_0 : i32, i32
  }
  func.func @transform_7(%arg0: i32) -> (i32, i32) {
    %c0_i32 = arith.constant 0 : i32
    %c0_i32_0 = arith.constant 0 : i32
    return %arg0, %c0_i32 : i32, i32
  }
}

</mosaic_0001>

<bundles_post_ra>
// kernel: forward.1
= control target key start
LH: loop header
LB: loop body
LE: loop exit
PB: predicated region body
PF: predicated region fallthrough
CT: control target
= control target key end

     0   :  { %v39_v38 = vlaneseq  ;;  %s1503_s0 = inlined_call_operand.vmem [shape: f32[2,256], index: 0, kind: input, shape index: {}]   ;;  %s1504_s1 = inlined_call_operand.vmem [shape: f32[2,256], index: 1, kind: input, shape index: {}]   ;;  %s1505_s2 = inlined_call_operand.vmem [shape: bf16[256,256], index: 2, kind: input, shape index: {}]   ;;  %s1506_s3 = inlined_call_operand.vmem [shape: bf16[256,256], index: 3, kind: input, shape index: {}]   ;;  %s1507_s4 = inlined_call_operand.vmem [shape: f32[1,256], index: 4, kind: input, shape index: {}]   ;;  %s1508_s5 = inlined_call_operand.vmem [shape: bf16[256,256], index: 5, kind: input, shape index: {}]   ;;  %s1509_s6 = inlined_call_operand.vmem [shape: f32[1,256], index: 6, kind: input, shape index: {}]   ;;  %s1510_s7 = inlined_call_operand.vmem [shape: bf16[2,256], index: 7, kind: output, shape index: {}]  }
   0x1   :  { %v992_v0 = vld [vmem:[%s1506_s3 + $0x4] ss:$8 sps:$4 sm:$0xff]   ;;  %v996_v2 = vld [vmem:[%s1506_s3] ss:$8 sps:$4 sm:$0xff]   ;;  %v998_v4 = vld [vmem:[%s1506_s3 + $0x14] ss:$8 sps:$4 sm:$0xff]  }
   0x2   :  { %v994_v1 = vld [vmem:[%s1505_s2 + $0x4] ss:$8 sps:$4 sm:$0xff]   ;;  %310 = vmatprep.subr.bf16.mxu0 %v992_v0  ;;  %v997_v3 = vld [vmem:[%s1505_s2] ss:$8 sps:$4 sm:$0xff]   ;;  %v1000_v5 = vld [vmem:[%s1505_s2 + $0x14] ss:$8 sps:$4 sm:$0xff]  }
   0x3   :  { %511 = vmatprep.subr.bf16.mxu1 %v994_v1  ;;  %311 = vmatpush1.bf16.msra.mxu0 %v996_v2  ;;  %v1002_v6 = vld [vmem:[%s1506_s3 + $0x10] ss:$8 sps:$4 sm:$0xff]   ;;  %v1004_v8 = vld [vmem:[%s1506_s3 + $0x24] ss:$8 sps:$4 sm:$0xff]   ;;  %v1008_v10 = vld [vmem:[%s1506_s3 + $0x20] ss:$8 sps:$4 sm:$0xff]  }
   0x4   :  { %512 = vmatpush1.bf16.msra.mxu1 %v997_v3  ;;  %312 = vmatprep.subr.bf16.mxu0 %v998_v4  ;;  %v1003_v7 = vld [vmem:[%s1505_s2 + $0x10] ss:$8 sps:$4 sm:$0xff]   ;;  %v1006_v9 = vld [vmem:[%s1505_s2 + $0x24] ss:$8 sps:$4 sm:$0xff]   ;;  %v1009_v11 = vld [vmem:[%s1505_s2 + $0x20] ss:$8 sps:$4 sm:$0xff]  }
   0x5   :  { %513 = vmatprep.subr.bf16.mxu1 %v1000_v5  ;;  %v1010_v12 = vld [vmem:[%s1506_s3 + $0x34] ss:$8 sps:$4 sm:$0xff]   ;;  %v1014_v14 = vld [vmem:[%s1506_s3 + $0x30] ss:$8 sps:$4 sm:$0xff]   ;;  %v1016_v16 = vld [vmem:[%s1506_s3 + $0x44] ss:$8 sps:$4 sm:$0xff]  }
   0x6   :  { %v1012_v13 = vld [vmem:[%s1505_s2 + $0x34] ss:$8 sps:$4 sm:$0xff]   ;;  %v1015_v15 = vld [vmem:[%s1505_s2 + $0x30] ss:$8 sps:$4 sm:$0xff]   ;;  %v1018_v17 = vld [vmem:[%s1505_s2 + $0x44] ss:$8 sps:$4 sm:$0xff]  }
   0x7   :  { %313 = vmatpush1.bf16.msra.mxu0 %v1002_v6  ;;  %v1020_v18 = vld [vmem:[%s1506_s3 + $0x40] ss:$8 sps:$4 sm:$0xff]   ;;  %v1022_v20 = vld [vmem:[%s1506_s3 + $0x54] ss:$8 sps:$4 sm:$0xff]   ;;  %v1026_v22 = vld [vmem:[%s1506_s3 + $0x50] ss:$8 sps:$4 sm:$0xff]  }
   0x8   :  { %514 = vmatpush1.bf16.msra.mxu1 %v1003_v7  ;;  %314 = vmatprep.subr.bf16.mxu0 %v1004_v8  ;;  %v1021_v19 = vld [vmem:[%s1505_s2 + $0x40] ss:$8 sps:$4 sm:$0xff]   ;;  %v1024_v21 = vld [vmem:[%s1505_s2 + $0x54] ss:$8 sps:$4 sm:$0xff]   ;;  %v1027_v23 = vld [vmem:[%s1505_s2 + $0x50] ss:$8 sps:$4 sm:$0xff]  }
   0x9   :  { %515 = vmatprep.subr.bf16.mxu1 %v1006_v9  ;;  %v1028_v24 = vld [vmem:[%s1506_s3 + $0x64] ss:$8 sps:$4 sm:$0xff]   ;;  %v1032_v26 = vld [vmem:[%s1506_s3 + $0x60] ss:$8 sps:$4 sm:$0xff]   ;;  %v1034_v28 = vld [vmem:[%s1506_s3 + $0x74] ss:$8 sps:$4 sm:$0xff]  }
   0xa   :  { %v1030_v25 = vld [vmem:[%s1505_s2 + $0x64] ss:$8 sps:$4 sm:$0xff]   ;;  %v1033_v27 = vld [vmem:[%s1505_s2 + $0x60] ss:$8 sps:$4 sm:$0xff]   ;;  %v1036_v29 = vld [vmem:[%s1505_s2 + $0x74] ss:$8 sps:$4 sm:$0xff]  }
   0xb   :  { %315 = vmatpush1.bf16.msra.mxu0 %v1008_v10  ;;  %v1038_v30 = vld [vmem:[%s1506_s3 + $0x70] ss:$8 sps:$4 sm:$0xff]   ;;  %v1040_v32 = vld [vmem:[%s1506_s3 + $0x84] ss:$8 sps:$4 sm:$0xff]   ;;  %v1044_v34 = vld [vmem:[%s1506_s3 + $0x80] ss:$8 sps:$4 sm:$0xff]  }
   0xc   :  { %516 = vmatpush1.bf16.msra.mxu1 %v1009_v11  ;;  %316 = vmatprep.subr.bf16.mxu0 %v1010_v12  ;;  %v1039_v31 = vld [vmem:[%s1505_s2 + $0x70] ss:$8 sps:$4 sm:$0xff]   ;;  %v1042_v33 = vld [vmem:[%s1505_s2 + $0x84] ss:$8 sps:$4 sm:$0xff]   ;;  %v1045_v35 = vld [vmem:[%s1505_s2 + $0x80] ss:$8 sps:$4 sm:$0xff]  }
   0xd   :  { %517 = vmatprep.subr.bf16.mxu1 %v1012_v13  ;;  %v1046_v36 = vld [vmem:[%s1506_s3 + $0x94] ss:$8 sps:$4 sm:$0xff]   ;;  %v1050_v39 = vld [vmem:[%s1506_s3 + $0x90] ss:$8 sps:$4 sm:$0xff]   ;;  %v1052_v41 = vld [vmem:[%s1506_s3 + $0xa4] ss:$8 sps:$4 sm:$0xff]  }
   0xe   :  { %v1048_v37 = vld [vmem:[%s1505_s2 + $0x94] ss:$8 sps:$4 sm:$0xff]   ;;  %v1051_v40 = vld [vmem:[%s1505_s2 + $0x90] ss:$8 sps:$4 sm:$0xff]   ;;  %v1054_v42 = vld [vmem:[%s1505_s2 + $0xa4] ss:$8 sps:$4 sm:$0xff]  }
   0xf   :  { %317 = vmatpush1.bf16.msra.mxu0 %v1014_v14  ;;  %v1315_v43 = vshrl.u32 %v39_v38, 7  ;;  %v1056_v44 = vld [vmem:[%s1506_s3 + $0xa0] ss:$8 sps:$4 sm:$0xff]   ;;  %v1058_v46 = vld [vmem:[%s1506_s3 + $0xb4] ss:$8 sps:$4 sm:$0xff]  }
  0x10   :  { %518 = vmatpush1.bf16.msra.mxu1 %v1015_v15  ;;  %318 = vmatprep.subr.bf16.mxu0 %v1016_v16  ;;  %v1057_v45 = vld [vmem:[%s1505_s2 + $0xa0] ss:$8 sps:$4 sm:$0xff]   ;;  %v1060_v47 = vld [vmem:[%s1505_s2 + $0xb4] ss:$8 sps:$4 sm:$0xff]   ;;  %v1062_v48 = vld [vmem:[%s1506_s3 + $0xb0] ss:$8 sps:$4 sm:$0xff]  }
  0x11   :  { %519 = vmatprep.subr.bf16.mxu1 %v1018_v17  ;;  %v1063_v49 = vld [vmem:[%s1505_s2 + $0xb0] ss:$8 sps:$4 sm:$0xff]   ;;  %v1064_v50 = vld [vmem:[%s1506_s3 + $0xc4] ss:$8 sps:$4 sm:$0xff]   ;;  %v1068_v56 = vld [vmem:[%s1506_s3 + $0xc0] ss:$8 sps:$4 sm:$0xff]  }
  0x12   :  { %v1066_v51 = vld [vmem:[%s1505_s2 + $0xc4] ss:$8 sps:$4 sm:$0xff]   ;;  %v1069_v57 = vld [vmem:[%s1505_s2 + $0xc0] ss:$8 sps:$4 sm:$0xff]   ;;  %v1070_v58 = vld [vmem:[%s1506_s3 + $0xd4] ss:$8 sps:$4 sm:$0xff]  }
  0x13   :  { %319 = vmatpush1.bf16.msra.mxu0 %v1020_v18  ;;  %v1144_v52 = vld.sshfl [vmem:[%s1504_s1] sm:$0xff pattern:$0x76325410]  ;;  %v1145_v53 = vld.sshfl [vmem:[%s1504_s1 + $0x8] sm:$0xff pattern:$0x76325410] }
  0x14   :  { %520 = vmatpush1.bf16.msra.mxu1 %v1021_v19  ;;  %320 = vmatprep.subr.bf16.mxu0 %v1022_v20  ;;  %v1146_v54 = vld.sshfl [vmem:[%s1503_s0] sm:$0xff pattern:$0x76325410]  ;;  %v1147_v55 = vld.sshfl [vmem:[%s1503_s0 + $0x8] sm:$0xff pattern:$0x76325410]  ;;  %v81_v59 = vcombine.high %v1144_v52, %v1145_v53  ;;  %v80_v9 = vcombine.low %v1144_v52, %v1145_v53 }
  0x15   :  { %521 = vmatprep.subr.bf16.mxu1 %v1024_v21  ;;  %v1072_v60 = vld [vmem:[%s1505_s2 + $0xd4] ss:$8 sps:$4 sm:$0xff]   ;;  %v51_v62 = vcombine.high %v1146_v54, %v1147_v55  ;;  %v1074_v63 = vld [vmem:[%s1506_s3 + $0xd0] ss:$8 sps:$4 sm:$0xff]   ;;  %v1076_v1 = vld [vmem:[%s1506_s3 + $0xe4] ss:$8 sps:$4 sm:$0xff]   ;;  %v50_v10 = vcombine.low %v1146_v54, %v1147_v55 }
  0x16   :  { %v85_v61 = vpack.c.bf16 %v81_v59, %v81_v59  ;;  %v1075_v0 = vld [vmem:[%s1505_s2 + $0xd0] ss:$8 sps:$4 sm:$0xff]   ;;  %v1078_v3 = vld [vmem:[%s1505_s2 + $0xe4] ss:$8 sps:$4 sm:$0xff]   ;;  %v1080_v4 = vld [vmem:[%s1506_s3 + $0xe0] ss:$8 sps:$4 sm:$0xff]   ;;  %v84_v13 = vpack.c.bf16 %v80_v9, %v80_v9 }
  0x17   :  { %321 = vmatpush1.bf16.msra.mxu0 %v1026_v22  ;;  %v55_v2 = vpack.c.bf16 %v51_v62, %v51_v62  ;;  %v1081_v5 = vld [vmem:[%s1505_s2 + $0xe0] ss:$8 sps:$4 sm:$0xff]   ;;  %v1082_v6 = vld [vmem:[%s1506_s3 + $0xf4] ss:$8 sps:$4 sm:$0xff]   ;;  %v1086_v8 = vld [vmem:[%s1506_s3 + $0xf0] ss:$8 sps:$4 sm:$0xff]   ;;  %v54_v14 = vpack.c.bf16 %v50_v10, %v50_v10 }
  0x18   :  { %522 = vmatpush1.bf16.msra.mxu1 %v1027_v23  ;;  %322 = vmatprep.subr.bf16.mxu0 %v1028_v24  ;;  %v1084_v7 = vld [vmem:[%s1505_s2 + $0xf4] ss:$8 sps:$4 sm:$0xff]   ;;  %v1087_v11 = vld [vmem:[%s1505_s2 + $0xf0] ss:$8 sps:$4 sm:$0xff]   ;;  %v1094_v12 = vld [vmem:[%s1508_s5 + $0x4] ss:$8 sps:$4 sm:$0xff]  }
  0x19   :  { %523 = vmatprep.subr.bf16.mxu1 %v1030_v25  ;;  %342 = vmatprep.mubr.bf16.mxu0 %v85_v61  ;;  %v1092_v15 = vld [vmem:[%s1508_s5] ss:$8 sps:$4 sm:$0xff]   ;;  %v1097_v16 = vld [vmem:[%s1508_s5 + $0x14] ss:$8 sps:$4 sm:$0xff]   ;;  %v1095_v17 = vld [vmem:[%s1508_s5 + $0x10] ss:$8 sps:$4 sm:$0xff]  }
  0x1a   :  { %543 = vmatprep.mubr.bf16.mxu1 %v55_v2  ;;  %v1100_v18 = vld [vmem:[%s1508_s5 + $0x24] ss:$8 sps:$4 sm:$0xff]   ;;  %v1098_v19 = vld [vmem:[%s1508_s5 + $0x20] ss:$8 sps:$4 sm:$0xff]   ;;  %v1103_v20 = vld [vmem:[%s1508_s5 + $0x34] ss:$8 sps:$4 sm:$0xff]  }
  0x1b   :  { %323 = vmatpush1.bf16.msra.mxu0 %v1032_v26  ;;  %v1101_v21 = vld [vmem:[%s1508_s5 + $0x30] ss:$8 sps:$4 sm:$0xff]   ;;  %v1106_v22 = vld [vmem:[%s1508_s5 + $0x44] ss:$8 sps:$4 sm:$0xff]   ;;  %v1104_v23 = vld [vmem:[%s1508_s5 + $0x40] ss:$8 sps:$4 sm:$0xff]  }
  0x1c   :  { %524 = vmatpush1.bf16.msra.mxu1 %v1033_v27  ;;  %324 = vmatprep.subr.bf16.mxu0 %v1034_v28  ;;  %v1109_v24 = vld [vmem:[%s1508_s5 + $0x54] ss:$8 sps:$4 sm:$0xff]   ;;  %v1107_v25 = vld [vmem:[%s1508_s5 + $0x50] ss:$8 sps:$4 sm:$0xff]   ;;  %v1112_v26 = vld [vmem:[%s1508_s5 + $0x64] ss:$8 sps:$4 sm:$0xff]  }
  0x1d   :  { %525 = vmatprep.subr.bf16.mxu1 %v1036_v29  ;;  %v1110_v27 = vld [vmem:[%s1508_s5 + $0x60] ss:$8 sps:$4 sm:$0xff]   ;;  %v1115_v28 = vld [vmem:[%s1508_s5 + $0x74] ss:$8 sps:$4 sm:$0xff]   ;;  %v1113_v29 = vld [vmem:[%s1508_s5 + $0x70] ss:$8 sps:$4 sm:$0xff]  }
  0x1e   :  { %v1130_v38 = vld [vmem:[%s1508_s5 + $0xc4] ss:$8 sps:$4 sm:$0xff]  }
  0x1f   :  { %325 = vmatpush1.bf16.msra.mxu0 %v1038_v30  ;;  %v1118_v30 = vld [vmem:[%s1508_s5 + $0x84] ss:$8 sps:$4 sm:$0xff]  }
  0x20   :  { %526 = vmatpush1.bf16.msra.mxu1 %v1039_v31  ;;  %326 = vmatprep.subr.bf16.mxu0 %v1040_v32  ;;  %v1116_v31 = vld [vmem:[%s1508_s5 + $0x80] ss:$8 sps:$4 sm:$0xff]   ;;  %v1121_v32 = vld [vmem:[%s1508_s5 + $0x94] ss:$8 sps:$4 sm:$0xff]  }
  0x21   :  { %527 = vmatprep.subr.bf16.mxu1 %v1042_v33  ;;  %v1119_v33 = vld [vmem:[%s1508_s5 + $0x90] ss:$8 sps:$4 sm:$0xff]  }
  0x23   :  { %327 = vmatpush1.bf16.msra.mxu0 %v1044_v34  ;;  %v1124_v34 = vld [vmem:[%s1508_s5 + $0xa4] ss:$8 sps:$4 sm:$0xff]  }
  0x24   :  { %528 = vmatpush1.bf16.msra.mxu1 %v1045_v35  ;;  %328 = vmatprep.subr.bf16.mxu0 %v1046_v36  ;;  %v1122_v35 = vld [vmem:[%s1508_s5 + $0xa0] ss:$8 sps:$4 sm:$0xff]   ;;  %v1127_v36 = vld [vmem:[%s1508_s5 + $0xb4] ss:$8 sps:$4 sm:$0xff]  }
  0x25   :  { %529 = vmatprep.subr.bf16.mxu1 %v1048_v37  ;;  %v1125_v37 = vld [vmem:[%s1508_s5 + $0xb0] ss:$8 sps:$4 sm:$0xff]  }
  0x27   :  { %329 = vmatpush1.bf16.msra.mxu0 %v1050_v39  ;;  %v1128_v39 = vld [vmem:[%s1508_s5 + $0xc0] ss:$8 sps:$4 sm:$0xff]  }
  0x28   :  { %530 = vmatpush1.bf16.msra.mxu1 %v1051_v40  ;;  %330 = vmatprep.subr.bf16.mxu0 %v1052_v41  ;;  %v1133_v40 = vld [vmem:[%s1508_s5 + $0xd4] ss:$8 sps:$4 sm:$0xff]   ;;  %v1131_v41 = vld [vmem:[%s1508_s5 + $0xd0] ss:$8 sps:$4 sm:$0xff]  }
  0x29   :  { %531 = vmatprep.subr.bf16.mxu1 %v1054_v42  ;;  %v1136_v42 = vld [vmem:[%s1508_s5 + $0xe4] ss:$8 sps:$4 sm:$0xff]  }
  0x2b   :  { %331 = vmatpush1.bf16.msra.mxu0 %v1056_v44  ;;  %v1134_v44 = vld [vmem:[%s1508_s5 + $0xe0] ss:$8 sps:$4 sm:$0xff]  }
  0x2c   :  { %532 = vmatpush1.bf16.msra.mxu1 %v1057_v45  ;;  %332 = vmatprep.subr.bf16.mxu0 %v1058_v46  ;;  %v1139_v45 = vld [vmem:[%s1508_s5 + $0xf4] ss:$8 sps:$4 sm:$0xff]   ;;  %v1137_v46 = vld [vmem:[%s1508_s5 + $0xf0] ss:$8 sps:$4 sm:$0xff]  }
  0x2d   :  { %533 = vmatprep.subr.bf16.mxu1 %v1060_v47  ;;  %v556_v47 = vsub.s32 0, %v1315_v43 }
  0x2f   :  { %333 = vmatpush1.bf16.msra.mxu0 %v1062_v48  ;;  %v552_v48 = vld [vmem:[%s1507_s4] sm:$0x3] }
  0x30   :  { %534 = vmatpush1.bf16.msra.mxu1 %v1063_v49  ;;  %334 = vmatprep.subr.bf16.mxu0 %v1064_v50  ;;  %v560_v49 = vsub.s32 1, %v1315_v43  ;;  %v557_v50 = vrot.slane %v552_v48, %v556_v47 }
  0x31   :  { %535 = vmatprep.subr.bf16.mxu1 %v1066_v51 }
  0x32   :  { %v561_v53 = vrot.slane %v552_v48, %v560_v49 }
  0x33   :  { %335 = vmatpush1.bf16.msra.mxu0 %v1068_v56 }
  0x34   :  { %536 = vmatpush1.bf16.msra.mxu1 %v1069_v57  ;;  %336 = vmatprep.subr.bf16.mxu0 %v1070_v58 }
  0x35   :  { %537 = vmatprep.subr.bf16.mxu1 %v1072_v60 }
  0x37   :  { %337 = vmatpush1.bf16.msra.mxu0 %v1074_v63 }
  0x38   :  { %538 = vmatpush1.bf16.msra.mxu1 %v1075_v0  ;;  %338 = vmatprep.subr.bf16.mxu0 %v1076_v1 }
  0x39   :  { %539 = vmatprep.subr.bf16.mxu1 %v1078_v3 }
  0x3b   :  { %339 = vmatpush1.bf16.msra.mxu0 %v1080_v4  ;;  %v602_v4 = vld [vmem:[%s1509_s6] sm:$0x3] }
  0x3c   :  { %540 = vmatpush1.bf16.msra.mxu1 %v1081_v5  ;;  %340 = vmatprep.subr.bf16.mxu0 %v1082_v6  ;;  %v1148_v5 = vmov 1966171168  }
  0x3d   :  { %541 = vmatprep.subr.bf16.mxu1 %v1084_v7  ;;  %v821_v6 = vunpack.c.l.s4 %v1148_v5  ;;  %v607_v7 = vrot.slane %v602_v4, %v556_v47 }
  0x3f   :  { %341 = vmatpush1.bf16.msra.mxu0 %v1086_v8  ;;  %v611_v8 = vrot.slane %v602_v4, %v560_v49  ;;  %v822_v9 = vunpack.c.0.s8 %v821_v6 }
  0x40   :  { %542 = vmatpush1.bf16.msra.mxu1 %v1087_v11  ;;  %774 = vmatprep.subr.bf16.mxu0 %v1094_v12 }
  0x42   :  { %343 = vmatmul.mubr.bf16.vlgmr.msra.gmra.mrb[0].mxu0 %v84_v13 }
  0x43   :  { %544 = vmatmul.mubr.bf16.vlgmr.msra.gmra.mrb[0].mxu1 %v54_v14  ;;  %775 = vmatpush1.bf16.msra.mxu0 %v1092_v15  ;;  %v825_v14 = vsub.s32 %v822_v9, %v1315_v43 }
  0x44   :  { %776 = vmatprep.subr.bf16.mxu0 %v1097_v16 }
  0x47   :  { %777 = vmatpush1.bf16.msra.mxu0 %v1095_v17 }
  0x48   :  { %778 = vmatprep.subr.bf16.mxu0 %v1100_v18 }
  0x4b   :  { %779 = vmatpush1.bf16.msra.mxu0 %v1098_v19 }
  0x4c   :  { %780 = vmatprep.subr.bf16.mxu0 %v1103_v20 }
  0x4f   :  { %781 = vmatpush1.bf16.msra.mxu0 %v1101_v21 }
  0x50   :  { %782 = vmatprep.subr.bf16.mxu0 %v1106_v22 }
  0x53   :  { %783 = vmatpush1.bf16.msra.mxu0 %v1104_v23 }
  0x54   :  { %784 = vmatprep.subr.bf16.mxu0 %v1109_v24 }
  0x57   :  { %785 = vmatpush1.bf16.msra.mxu0 %v1107_v25 }
  0x58   :  { %786 = vmatprep.subr.bf16.mxu0 %v1112_v26 }
  0x5b   :  { %787 = vmatpush1.bf16.msra.mxu0 %v1110_v27 }
  0x5c   :  { %788 = vmatprep.subr.bf16.mxu0 %v1115_v28 }
  0x5f   :  { %789 = vmatpush1.bf16.msra.mxu0 %v1113_v29 }
  0x60   :  { %790 = vmatprep.subr.bf16.mxu0 %v1118_v30 }
  0x63   :  { %791 = vmatpush1.bf16.msra.mxu0 %v1116_v31 }
  0x64   :  { %792 = vmatprep.subr.bf16.mxu0 %v1121_v32 }
  0x67   :  { %793 = vmatpush1.bf16.msra.mxu0 %v1119_v33 }
  0x68   :  { %794 = vmatprep.subr.bf16.mxu0 %v1124_v34 }
  0x6b   :  { %795 = vmatpush1.bf16.msra.mxu0 %v1122_v35 }
  0x6c   :  { %796 = vmatprep.subr.bf16.mxu0 %v1127_v36 }
  0x6f   :  { %797 = vmatpush1.bf16.msra.mxu0 %v1125_v37 }
  0x70   :  { %798 = vmatprep.subr.bf16.mxu0 %v1130_v38 }
  0x73   :  { %799 = vmatpush1.bf16.msra.mxu0 %v1128_v39 }
  0x74   :  { %800 = vmatprep.subr.bf16.mxu0 %v1133_v40 }
  0x77   :  { %801 = vmatpush1.bf16.msra.mxu0 %v1131_v41 }
  0x78   :  { %802 = vmatprep.subr.bf16.mxu0 %v1136_v42 }
  0x7b   :  { %803 = vmatpush1.bf16.msra.mxu0 %v1134_v44 }
  0x7c   :  { %804 = vmatprep.subr.bf16.mxu0 %v1139_v45 }
  0x7f   :  { %805 = vmatpush1.bf16.msra.mxu0 %v1137_v46 }
 0x115   :  { %v344_v51 = vpop.f32.mrb[0].mxu0 }
 0x116   :  { %v545_v52 = vpop.f32.mrb[0].mxu1  ;;  %v346_v55 = vpop.f32.mrb[1].mxu0 }
 0x117   :  { %v546_v54 = vadd.f32 %v545_v52, %v344_v51  ;;  %v547_v56 = vpop.f32.mrb[1].mxu1  ;;  %v348_v58 = vpop.f32.mrb[2].mxu0 }
 0x118   :  { %v548_v57 = vadd.f32 %v547_v56, %v346_v55  ;;  %v549_v59 = vpop.f32.mrb[2].mxu1  ;;  %v349_v61 = vpop.f32.mrb[3].mxu0 }
 0x119   :  { %v564_v60 = vadd.f32 %v557_v50, %v546_v54  ;;  %v550_v62 = vpop.f32.mrb[3].mxu1 }
 0x11a   :  { %v565_v63 = vadd.f32 %v561_v53, %v548_v57 }
 0x11b   :  { %1140 = vtanh.f32 %v564_v60 }
 0x11c   :  { %1142 = vtanh.f32 %v565_v63 }
 0x125   :  { %v1141_v0 = vpop.eup %1140 }
 0x126   :  { %v1143_v1 = vpop.eup %1142  ;;  %v568_v3 = vpack.c.bf16 %v1141_v0, %v1141_v0 }
 0x127   :  { %v569_v2 = vpack.c.bf16 %v1143_v1, %v1143_v1 }
 0x129   :  { %806 = vmatprep.mubr.bf16.mxu0 %v569_v2 }
 0x12a   :  { %807 = vmatmul.mubr.bf16.vlgmr.msra.gmra.mrb[4].mxu0 %v568_v3 }
 0x1fd   :  { %v808_v10 = vpop.f32.mrb[4].mxu0 }
 0x1fe   :  { %v809_v11 = vadd.f32 %v808_v10, %v607_v7  ;;  %v810_v12 = vpop.f32.mrb[5].mxu0 }
 0x1ff   :  { %v811_v13 = vadd.f32 %v810_v12, %v611_v8  ;;  %v812_v15 = vpop.f32.mrb[6].mxu0 }
 0x200   :  { %v813_v16 = vpop.f32.mrb[7].mxu0 }
 0x201   :  { %v987_v17 = vpack.c.bf16 %v811_v13, %v809_v11 }
 0x203   :  { %v826_v18 = vrot.slane %v987_v17, %v825_v14 }
 0x205   :  { %988 = vst.sshfl [vmem:[#allocation2] sm:$0x5 pattern:$0x73625140] %v826_v18 }
 0x20c   :  { %v869_v19 = vld [vmem:[#allocation2] sm:$0x3] }
 0x20d   :  { %870 = vst [vmem:[%s1510_s7] sm:$0x3] %v869_v19 }

</bundles_post_ra>
